<compile_context>
chip_gen: v7x
topology: tpu7x:2x2x1
jax: 0.10.0
libtpu: 0.0.40
codegen_flags: <defaults>
</compile_context>

<pallas_src>
import jax
import jax.numpy as jnp
from jax.experimental import pallas as pl
from jax.experimental.pallas import tpu as pltpu

_LANE = 128
_TARGET_TILE_BYTES = 4 * 1024 * 1024       # ~4 MiB blocks for the 2-D path
_TARGET_TILE_BYTES_1D = 512 * 1024         # smaller blocks for the rare 1-D path
_VMEM_LIMIT_BYTES = 32 * 1024 * 1024       # covers in+out double-buffered 4 MiB tiles
_MIN_PALLAS_BYTES = 256 * 1024             # below this, plain jnp (XLA fuses it)


def _round_up(a, b):
    return ((a + b - 1) // b) * b


def _h_sigmoid_kernel(x_ref, o_ref):
    x = x_ref[...]
    # ReLU6(x + 3) / 6 == clamp(x + 3, 0, 6) * (1/6)
    o_ref[...] = (jnp.clip(x + 3.0, 0.0, 6.0) * (1.0 / 6.0)).astype(o_ref.dtype)


def _h_sigmoid_jnp(x):
    return jnp.clip(x + 3.0, 0.0, 6.0) * (1.0 / 6.0)


def _pick_cols(n):
    """Largest lane-dense column width that divides n exactly (else None)."""
    for cols in (1024, 512, 256, 128):
        if n % cols == 0:
            return cols
    return None


def _compiler_params():
    return pltpu.CompilerParams(
        dimension_semantics=("parallel",),
        vmem_limit_bytes=_VMEM_LIMIT_BYTES,
    )


def h_sigmoid(x: jax.Array, *, min_pallas_bytes: int = _MIN_PALLAS_BYTES,
              donate: bool = False) -> jax.Array:
    """Elementwise hard-sigmoid matching torch: relu6(x + 3) / 6.

    Accepts any-rank floating input (e.g. NCHW activations). Computation runs
    in a Pallas kernel on a flattened, lane-dense view with byte-sized tiles.
    Set `donate=True` only if the caller donates x (buffer reuse via aliasing).
    """
    if not jnp.issubdtype(x.dtype, jnp.floating):
        # TODO(synk): integer inputs (torch promotes on the /6); restricted to floats here.
        raise TypeError(f"h_sigmoid expects a floating dtype, got {x.dtype}")

    n = x.size
    itemsize = jnp.dtype(x.dtype).itemsize
    if n == 0 or n * itemsize < min_pallas_bytes:
        return _h_sigmoid_jnp(x)

    orig_shape = x.shape
    sub = 32 // itemsize                # sublane packing: 8 (f32) / 16 (bf16) / 32 (int8)
    aliases = {0: 0} if donate else {}

    cols = _pick_cols(n)
    if cols is not None:
        # --- 2-D lane-dense path (no copies: reshape of contiguous data is free) ---
        rows = n // cols
        bm_target = max(sub, (_TARGET_TILE_BYTES // (cols * itemsize)) // sub * sub)
        if rows > bm_target:
            bm = bm_target
        elif rows >= 2 * sub:
            bm = _round_up(pl.cdiv(rows, 2), sub)   # >=2 grid steps -> both v7x TCs
        else:
            bm = rows                               # single full-extent block (legal)
        grid = (pl.cdiv(rows, bm),)
        out2d = pl.pallas_call(
            _h_sigmoid_kernel,
            out_shape=jax.ShapeDtypeStruct((rows, cols), x.dtype),
            grid=grid,
            in_specs=[pl.BlockSpec((bm, cols), lambda i: (i, 0))],
            out_specs=pl.BlockSpec((bm, cols), lambda i: (i, 0)),
            input_output_aliases=aliases,
            compiler_params=_compiler_params(),
        )(x.reshape(rows, cols))
        return out2d.reshape(orig_shape)

    # --- 1-D fallback: n not a multiple of 128. Pallas masks the partial tail block. ---
    align = sub * _LANE
    if n < 2 * align:
        return _h_sigmoid_jnp(x)        # tiny & oddly sized: not worth a kernel
    tile_target = _TARGET_TILE_BYTES_1D // itemsize     # multiple of align
    blk = min(tile_target, _round_up(pl.cdiv(n, 2), align))
    grid = (pl.cdiv(n, blk),)
    out1d = pl.pallas_call(
        _h_sigmoid_kernel,
        out_shape=jax.ShapeDtypeStruct((n,), x.dtype),
        grid=grid,
        in_specs=[pl.BlockSpec((blk,), lambda i: (i,))],
        out_specs=pl.BlockSpec((blk,), lambda i: (i,)),
        input_output_aliases=aliases,
        compiler_params=_compiler_params(),
    )(x.reshape(n))
    return out1d.reshape(orig_shape)


if __name__ == "__main__":
    def ref(v):
        return jnp.clip(v + 3.0, 0.0, 6.0) / 6.0

    # 1) Module-spec-sized NCHW activation; force the Pallas 2-D path (cols=1024).
    x1 = jax.random.normal(jax.random.PRNGKey(0), (2, 4, 16, 16), dtype=jnp.float32) * 4.0
    y1 = jax.block_until_ready(h_sigmoid(x1, min_pallas_bytes=0))
    assert y1.shape == x1.shape and y1.dtype == x1.dtype
    assert jnp.max(jnp.abs(y1 - ref(x1))) < 1e-6

    # 2) Typical mid-network activation: n divisible by 512 but not 1024 -> 2-D, 2 grid steps.
    x2 = jax.random.normal(jax.random.PRNGKey(1), (1, 24, 56, 56), dtype=jnp.float32) * 4.0
    y2 = jax.block_until_ready(h_sigmoid(x2, min_pallas_bytes=0))
    assert y2.shape == x2.shape and y2.dtype == x2.dtype
    assert jnp.max(jnp.abs(y2 - ref(x2))) < 1e-6

    # 3) Odd element count (not a multiple of 128) -> 1-D masked-tail path, no pad/slice.
    x3 = jax.random.normal(jax.random.PRNGKey(2), (1, 3, 131, 131), dtype=jnp.float32) * 4.0
    y3 = jax.block_until_ready(h_sigmoid(x3, min_pallas_bytes=0))
    assert y3.shape == x3.shape and y3.dtype == x3.dtype
    assert jnp.max(jnp.abs(y3 - ref(x3))) < 1e-6

    # 4) Tiny input below the threshold -> plain jnp path (still correct).
    x4 = jax.random.normal(jax.random.PRNGKey(3), (1, 3, 7, 7), dtype=jnp.float32) * 4.0
    y4 = jax.block_until_ready(h_sigmoid(x4))
    assert y4.shape == x4.shape and y4.dtype == x4.dtype
    assert jnp.max(jnp.abs(y4 - ref(x4))) < 1e-6

    # 5) bf16 activation (stays in bf16 end-to-end, like torch autocast).
    x5 = (jax.random.normal(jax.random.PRNGKey(4), (2, 8, 32, 32)) * 4.0).astype(jnp.bfloat16)
    y5 = jax.block_until_ready(h_sigmoid(x5, min_pallas_bytes=0))
    assert y5.shape == x5.shape and y5.dtype == jnp.bfloat16
    assert jnp.max(jnp.abs(y5.astype(jnp.float32) - ref(x5.astype(jnp.float32)))) < 2e-2

    print("KERNEL_OK")
</pallas_src>

<mosaic_0001>
module attributes {stable_mosaic.version = 11 : i64} {
  func.func @_h_sigmoid_kernel(%arg0: i32, %arg1: memref<2x1024xf32, #tpu.memory_space<vmem>>, %arg2: memref<2x1024xf32, #tpu.memory_space<vmem>>) attributes {dimension_semantics = [#tpu.dimension_semantics<parallel>], iteration_bounds = array<i64: 1>, scalar_prefetch = 0 : i64, scratch_operands = 0 : i64, tpu.core_type = #tpu.core_type<tc>, window_params = [{transform_indices = @transform_0, window_bounds = array<i64: 2, 1024>}, {transform_indices = @transform_1, window_bounds = array<i64: 2, 1024>}]} {
    %c0 = arith.constant 0 : index
    %c0_0 = arith.constant 0 : index
    %0 = vector.load %arg1[%c0, %c0_0] : memref<2x1024xf32, #tpu.memory_space<vmem>>, vector<2x1024xf32>
    %cst = arith.constant 3.000000e+00 : f32
    %1 = vector.broadcast %cst : f32 to vector<2x1024xf32>
    %2 = arith.addf %0, %1 : vector<2x1024xf32>
    %cst_1 = arith.constant 0.000000e+00 : f32
    %cst_2 = arith.constant 6.000000e+00 : f32
    %3 = vector.broadcast %cst_1 : f32 to vector<2x1024xf32>
    %4 = arith.maximumf %3, %2 : vector<2x1024xf32>
    %5 = vector.broadcast %cst_2 : f32 to vector<2x1024xf32>
    %6 = arith.minimumf %5, %4 : vector<2x1024xf32>
    %cst_3 = arith.constant 0.166666672 : f32
    %7 = vector.broadcast %cst_3 : f32 to vector<2x1024xf32>
    %8 = arith.mulf %6, %7 : vector<2x1024xf32>
    %c0_4 = arith.constant 0 : index
    %c0_5 = arith.constant 0 : index
    %9 = vector.load %arg2[%c0_4, %c0_5] : memref<2x1024xf32, #tpu.memory_space<vmem>>, vector<2x1024xf32>
    tpu.vector_store %arg2[%c0_4, %c0_5], %8 {strides = array<i32>} : memref<2x1024xf32, #tpu.memory_space<vmem>>, vector<2x1024xf32>,
    return
  }
  func.func @transform_0(%arg0: i32) -> (i32, i32) {
    %c0_i32 = arith.constant 0 : i32
    %c0_i32_0 = arith.constant 0 : i32
    return %arg0, %c0_i32 : i32, i32
  }
  func.func @transform_1(%arg0: i32) -> (i32, i32) {
    %c0_i32 = arith.constant 0 : i32
    %c0_i32_0 = arith.constant 0 : i32
    return %arg0, %c0_i32 : i32, i32
  }
}

</mosaic_0001>

<bundles_post_ra>
// kernel: tpu_custom_call.1
= control target key start
LH: loop header
LB: loop body
LE: loop exit
PB: predicated region body
PF: predicated region fallthrough
CT: control target
= control target key end

     0   :  { %6 = vsyncpa [#allocation3], 0  ;;  %s134_s0 = inlined_call_operand.hbm [shape: f32[2,1024], index: 0, kind: input, shape index: {}]   ;;  %s135_s1 = inlined_call_operand.hbm [shape: f32[2,1024], index: 1, kind: output, shape index: {}]  }
   0x1   :  { %7 = vsyncpa [#allocation4], 0  ;;  %s98_s6 = smov [#allocation2]   ;;  %s50_s10 = scalar_lea.hbm %s134_s0, 256 }
   0x2   :  { %s14_s7 = sshll.u32 %s98_s6, 4  ;;  %p51_p0 = scmp.ne.s32.totalorder %s134_s0, %s50_s10  ;;  %s15_s7 = int_to_ptr.vmem [resolvable:$true] %s14_s7 }
   0x3   :  { %p54_p1 = scmp.lt.u32.totalorder %s50_s10, %s134_s0 }
   0x5   :  { %p56_p2 = pnand %p54_p1, %p51_p0 }
   0x7   :  { %59 = shalt.err (!%p56_p2)
}
   0x8   :  { %s60_s15 = scalar_lea.vmem %s15_s7, 256  ;;  %p65_p4 = scmp.lt.s32.totalorder %s15_s7, %s15_s7 }
   0x9   :  { %p61_p3 = scmp.ne.s32.totalorder %s15_s7, %s60_s15  ;;  %p66_p5 = scmp.lt.s32.totalorder %s60_s15, %s60_s15 }
   0xb   :  { %p67_p6 = por %p66_p5, %p65_p4 }
   0xd   :  { %p68_p7 = pnand %p67_p6, %p61_p3 }
   0xf   :  { %71 = shalt.err (!%p68_p7)
}
  0x10   :  { %17 = dma.hbm_to_vmem [thread:$0]  %s134_s0, 256, %s15_s7, [#allocation3]  }
  0x11   :  { %94 = dma.done.wait [#allocation3], 256  }
  0x12   :  { %95 = vsyncadd [#allocation3], 4294967040  ;;  %v21_v0 = vld [vmem:[#allocation2] sm:$0xff]  ;;  %v22_v1 = vld [vmem:[#allocation2 + $0x8] sm:$0xff]  ;;  %s99_s18 = smov [#allocation5]  }
  0x13   :  { %v23_v2 = vadd.f32 3.0, %v21_v0  ;;  %v24_v3 = vadd.f32 3.0, %v22_v1  ;;  %s39_s19 = sshll.u32 %s99_s18, 4  ;;  %s40_s19 = int_to_ptr.vmem [resolvable:$true] %s39_s19 }
  0x14   :  { %s72_s20 = scalar_lea.vmem %s40_s19, 256  ;;  %p77_p9 = scmp.lt.s32.totalorder %s40_s19, %s40_s19 }
  0x15   :  { %v25_v4 = vmax.f32 %v23_v2, 0.0  ;;  %v26_v5 = vmax.f32 %v24_v3, 0.0  ;;  %p73_p8 = scmp.ne.s32.totalorder %s40_s19, %s72_s20  ;;  %p78_p10 = scmp.lt.s32.totalorder %s72_s20, %s72_s20 }
  0x17   :  { %v27_v6 = vmin.f32 %v25_v4, 6.0  ;;  %v28_v7 = vmin.f32 %v26_v5, 6.0  ;;  %p79_p11 = por %p78_p10, %p77_p9 }
  0x19   :  { %v29_v8 = vmul.f32 0.16666667, %v27_v6  ;;  %v30_v9 = vmul.f32 0.16666667, %v28_v7  ;;  %p80_p12 = pnand %p79_p11, %p73_p8 }
  0x1b   :  { %31 = vst [vmem:[#allocation5] sm:$0xff] %v29_v8  ;;  %32 = vst [vmem:[#allocation5 + $0x8] sm:$0xff] %v30_v9 }
  0x1c   :  { %83 = shalt.err (!%p80_p12)
}
  0x1d   :  { %s84_s22 = scalar_lea.hbm %s135_s1, 256 }
  0x1e   :  { %p85_p13 = scmp.ne.s32.totalorder %s135_s1, %s84_s22  ;;  %p88_p0 = scmp.lt.u32.totalorder %s84_s22, %s135_s1 }
  0x20   :  { %p90_p1 = pnand %p88_p0, %p85_p13 }
  0x22   :  { %93 = shalt.err (!%p90_p1)
}
  0x23   :  { %42 = dma.vmem_to_hbm [thread:$0]  %s40_s19, 256, %s135_s1, [#allocation4]  }
  0x24   :  { %96 = dma.done.wait [#allocation4], 256  }
  0x25   :  { %97 = vsyncadd [#allocation4], 4294967040 }
  0x26   :  { %46 = vsyncpa [#allocation3], 1 }
  0x27   :  { %47 = vsyncpa [#allocation4], 1 }

</bundles_post_ra>
